<compile_context>
chip_gen: v6e
topology: v6e:2x2x1
jax: 0.10.0
libtpu: 0.0.40
codegen_flags: <defaults>
</compile_context>

<pallas_src>
import jax
import jax.numpy as jnp
from jax.experimental import pallas as pl
from jax.experimental.pallas import tpu as pltpu

# MLP dims from the PyTorch module:
#   Linear(153,33) ReLU Linear(33,150) ReLU Linear(150,400) ReLU
#   Linear(400,168) ReLU Linear(168,128) ReLU Linear(128,1)
DIMS = [153, 33, 150, 400, 168, 128, 1]
N_LAYERS = len(DIMS) - 1  # 6


def _round_up(n, m):
    return ((n + m - 1) // m) * m


# Hidden dims lane-aligned to 128; input dim kept at its true width (153),
# final output stays width 1.
PAD_HIDDEN = [_round_up(d, 128) for d in DIMS[1:-1]]   # [128, 256, 512, 256, 128]
IN_PADS = [DIMS[0]] + PAD_HIDDEN                       # per-layer padded in dims
OUT_PADS = PAD_HIDDEN + [DIMS[-1]]                     # per-layer padded out dims


def mlp_kernel(x_ref,
               w1, b1, w2, b2, w3, b3, w4, b4, w5, b5,
               w6, b6,
               o_ref):
    """Whole-MLP hot path: 5 fused bf16 matmuls (f32 acc) + bias + ReLU, then a
    VPU multiply + lane-reduction for the final width-1 layer, all in VMEM."""
    weights = (w1, w2, w3, w4, w5)
    biases = (b1, b2, b3, b4, b5)

    # bf16 MXU operands; cast happens in-kernel so the wrapper never
    # materializes a casted/padded copy of x in HBM.
    h = x_ref[...].astype(jnp.bfloat16)                       # (tile_b, 153)
    for li in range(5):
        acc = jnp.dot(h, weights[li][...],
                      preferred_element_type=jnp.float32)     # MXU, f32 accumulate
        acc = jnp.maximum(acc + biases[li][...], 0.0)         # f32 bias + ReLU (VPU)
        if li < 4:
            h = acc.astype(jnp.bfloat16)                      # bf16 operand for next MXU op
        else:
            h = acc                                           # keep f32 for the epilogue

    # Final Linear(128, 1): VPU multiply + XLU lane reduction instead of an
    # N=1 MXU matmul.
    out = jnp.sum(h * w6[...], axis=-1, keepdims=True) + b6[...]
    o_ref[...] = out.astype(o_ref.dtype)


def init_params(key):
    """Deterministic PyTorch-Linear-style init: U(-1/sqrt(fan_in), +1/sqrt(fan_in)).

    Weights stored pre-transposed as (in, out) so y = x @ W + b matches
    nn.Linear's x @ W^T + b.  (Exact torch.manual_seed(0) values are not
    reproducible without torch; init distribution matches.)
    """
    params = []
    for li in range(N_LAYERS):
        fan_in, fan_out = DIMS[li], DIMS[li + 1]
        key, kw, kb = jax.random.split(key, 3)
        bound = 1.0 / jnp.sqrt(float(fan_in))
        w = jax.random.uniform(kw, (fan_in, fan_out), jnp.float32, -bound, bound)
        b = jax.random.uniform(kb, (1, fan_out), jnp.float32, -bound, bound)
        params.append((w, b))
    return params


def prepare_params(params):
    """Zero-pad hidden dims to 128-multiples; weights -> bf16, biases stay f32.
    Last layer is stored as an f32 (1, 128) row + (1, 1) bias for the
    multiply+reduce epilogue."""
    prepped = []
    for li, (w, b) in enumerate(params):
        if li < N_LAYERS - 1:
            in_p, out_p = IN_PADS[li], OUT_PADS[li]
            wp = jnp.zeros((in_p, out_p), jnp.float32)
            wp = wp.at[:w.shape[0], :w.shape[1]].set(w)
            bp = jnp.zeros((1, out_p), jnp.float32)
            bp = bp.at[:, :b.shape[1]].set(b)
            prepped.append((wp.astype(jnp.bfloat16), bp))
        else:
            # (128, 1) -> (1, 128) f32 row; bias (1, 1) f32.
            prepped.append((w.reshape(1, -1).astype(jnp.float32),
                            b.astype(jnp.float32)))
    return prepped


def _choose_tile_b(batch):
    """Adaptive row-tile size (per perf review):
      - small batch: one short tile -> low latency, no wasted MXU rows;
      - large batch: 256-1024-row tiles and >=2 grid steps so both v7x
        TensorCores get work while per-grid-step overhead is amortized."""
    batch = max(int(batch), 1)
    if batch <= 256:
        return _round_up(batch, 8)
    tile = min(1024, _round_up((batch + 1) // 2, 16))
    return max(256, tile)


@jax.jit
def nn_forward(x, padded_params):
    batch = x.shape[0]
    tile_b = _choose_tile_b(batch)        # static under jit (depends on shape only)
    grid = (pl.cdiv(batch, tile_b),)

    flat_params = []
    param_specs = []
    for w, b in padded_params:
        flat_params.extend([w, b])
        # Full-array blocks with constant index maps: DMA'd once, VMEM-resident
        # for every grid step.
        param_specs.append(pl.BlockSpec(w.shape, lambda i: (0, 0)))
        param_specs.append(pl.BlockSpec(b.shape, lambda i: (0, 0)))

    return pl.pallas_call(
        mlp_kernel,
        out_shape=jax.ShapeDtypeStruct((batch, 1), jnp.float32),
        grid_spec=pltpu.PrefetchScalarGridSpec(
            num_scalar_prefetch=0,
            grid=grid,
            in_specs=[pl.BlockSpec((tile_b, DIMS[0]), lambda i: (i, 0))]
                     + param_specs,
            out_specs=pl.BlockSpec((tile_b, 1), lambda i: (i, 0)),
        ),
        compiler_params=pltpu.CompilerParams(
            dimension_semantics=("parallel",)),   # batch tiles shard across TCs on v7x
    )(x, *flat_params)


def reference_forward(x, padded_params):
    """Pure-JAX reference doing the same bf16-operand / f32-accumulate math."""
    h = x.astype(jnp.bfloat16)
    for li in range(5):
        w, b = padded_params[li]
        acc = jnp.maximum(
            jnp.dot(h, w, preferred_element_type=jnp.float32) + b, 0.0)
        h = acc.astype(jnp.bfloat16) if li < 4 else acc
    w6, b6 = padded_params[5]
    return jnp.sum(h * w6, axis=-1, keepdims=True) + b6


if __name__ == "__main__":
    key = jax.random.PRNGKey(0)
    key, kx = jax.random.split(key)

    params = init_params(key)
    padded_params = prepare_params(params)

    # batch=8 exercises the small-batch latency path (single exact tile);
    # batch=300 exercises a multi-step grid with a partial last tile.
    for batch in (8, 300):
        x = jax.random.normal(jax.random.fold_in(kx, batch),
                              (batch, DIMS[0]), jnp.float32)
        out = jax.block_until_ready(nn_forward(x, padded_params))
        assert out.shape == (batch, 1), out.shape

        ref = reference_forward(x, padded_params)
        assert jnp.allclose(out, ref, atol=2e-2, rtol=2e-2), \
            f"batch={batch} max err {jnp.max(jnp.abs(out - ref))}"

    print("KERNEL_OK")
</pallas_src>

<mosaic_0001>
module attributes {stable_mosaic.version = 11 : i64} {
  func.func @mlp_kernel(%arg0: i32, %arg1: memref<8x153xf32, #tpu.memory_space<vmem>>, %arg2: memref<153x128xbf16, #tpu.memory_space<vmem>>, %arg3: memref<1x128xf32, #tpu.memory_space<vmem>>, %arg4: memref<128x256xbf16, #tpu.memory_space<vmem>>, %arg5: memref<1x256xf32, #tpu.memory_space<vmem>>, %arg6: memref<256x512xbf16, #tpu.memory_space<vmem>>, %arg7: memref<1x512xf32, #tpu.memory_space<vmem>>, %arg8: memref<512x256xbf16, #tpu.memory_space<vmem>>, %arg9: memref<1x256xf32, #tpu.memory_space<vmem>>, %arg10: memref<256x128xbf16, #tpu.memory_space<vmem>>, %arg11: memref<1x128xf32, #tpu.memory_space<vmem>>, %arg12: memref<1x128xf32, #tpu.memory_space<vmem>>, %arg13: memref<1x1xf32, #tpu.memory_space<vmem>>, %arg14: memref<8x1xf32, #tpu.memory_space<vmem>>) attributes {dimension_semantics = [#tpu.dimension_semantics<parallel>], iteration_bounds = array<i64: 1>, scalar_prefetch = 0 : i64, scratch_operands = 0 : i64, tpu.core_type = #tpu.core_type<tc>, window_params = [{transform_indices = @transform_0, window_bounds = array<i64: 8, 153>}, {pipeline_mode = #tpu.pipeline_mode<synchronous>, transform_indices = @transform_1, window_bounds = array<i64: 153, 128>}, {pipeline_mode = #tpu.pipeline_mode<synchronous>, transform_indices = @transform_2, window_bounds = array<i64: 1, 128>}, {pipeline_mode = #tpu.pipeline_mode<synchronous>, transform_indices = @transform_3, window_bounds = array<i64: 128, 256>}, {pipeline_mode = #tpu.pipeline_mode<synchronous>, transform_indices = @transform_4, window_bounds = array<i64: 1, 256>}, {pipeline_mode = #tpu.pipeline_mode<synchronous>, transform_indices = @transform_5, window_bounds = array<i64: 256, 512>}, {pipeline_mode = #tpu.pipeline_mode<synchronous>, transform_indices = @transform_6, window_bounds = array<i64: 1, 512>}, {pipeline_mode = #tpu.pipeline_mode<synchronous>, transform_indices = @transform_7, window_bounds = array<i64: 512, 256>}, {pipeline_mode = #tpu.pipeline_mode<synchronous>, transform_indices = @transform_8, window_bounds = array<i64: 1, 256>}, {pipeline_mode = #tpu.pipeline_mode<synchronous>, transform_indices = @transform_9, window_bounds = array<i64: 256, 128>}, {pipeline_mode = #tpu.pipeline_mode<synchronous>, transform_indices = @transform_10, window_bounds = array<i64: 1, 128>}, {pipeline_mode = #tpu.pipeline_mode<synchronous>, transform_indices = @transform_11, window_bounds = array<i64: 1, 128>}, {pipeline_mode = #tpu.pipeline_mode<synchronous>, transform_indices = @transform_12, window_bounds = array<i64: 1, 1>}, {transform_indices = @transform_13, window_bounds = array<i64: 8, 1>}]} {
    %c0 = arith.constant 0 : index
    %c0_0 = arith.constant 0 : index
    %0 = vector.load %arg1[%c0, %c0_0] : memref<8x153xf32, #tpu.memory_space<vmem>>, vector<8x153xf32>
    %1 = arith.truncf %0 : vector<8x153xf32> to vector<8x153xbf16>
    %c0_1 = arith.constant 0 : index
    %c0_2 = arith.constant 0 : index
    %2 = vector.load %arg2[%c0_1, %c0_2] : memref<153x128xbf16, #tpu.memory_space<vmem>>, vector<153x128xbf16>
    %cst = arith.constant dense<0.000000e+00> : vector<8x128xf32>
    %3 = tpu.matmul %1, %2, %cst {dimension_numbers = #tpu.dot_dimension_numbers<[1], [0], [0], [1], [0, 0, 1, 1], [], []>} : vector<8x153xbf16>, vector<153x128xbf16>, vector<8x128xf32> -> vector<8x128xf32>
    %c0_3 = arith.constant 0 : index
    %c0_4 = arith.constant 0 : index
    %4 = vector.load %arg3[%c0_3, %c0_4] : memref<1x128xf32, #tpu.memory_space<vmem>>, vector<1x128xf32>
    %5 = vector.broadcast %4 : vector<1x128xf32> to vector<8x128xf32>
    %6 = arith.addf %3, %5 : vector<8x128xf32>
    %cst_5 = arith.constant 0.000000e+00 : f32
    %7 = vector.broadcast %cst_5 : f32 to vector<8x128xf32>
    %8 = arith.maximumf %6, %7 : vector<8x128xf32>
    %9 = arith.truncf %8 : vector<8x128xf32> to vector<8x128xbf16>
    %c0_6 = arith.constant 0 : index
    %c0_7 = arith.constant 0 : index
    %10 = vector.load %arg4[%c0_6, %c0_7] : memref<128x256xbf16, #tpu.memory_space<vmem>>, vector<128x256xbf16>
    %cst_8 = arith.constant dense<0.000000e+00> : vector<8x256xf32>
    %11 = tpu.matmul %9, %10, %cst_8 {dimension_numbers = #tpu.dot_dimension_numbers<[1], [0], [0], [1], [0, 0, 1, 1], [], []>} : vector<8x128xbf16>, vector<128x256xbf16>, vector<8x256xf32> -> vector<8x256xf32>
    %c0_9 = arith.constant 0 : index
    %c0_10 = arith.constant 0 : index
    %12 = vector.load %arg5[%c0_9, %c0_10] : memref<1x256xf32, #tpu.memory_space<vmem>>, vector<1x256xf32>
    %13 = vector.broadcast %12 : vector<1x256xf32> to vector<8x256xf32>
    %14 = arith.addf %11, %13 : vector<8x256xf32>
    %cst_11 = arith.constant 0.000000e+00 : f32
    %15 = vector.broadcast %cst_11 : f32 to vector<8x256xf32>
    %16 = arith.maximumf %14, %15 : vector<8x256xf32>
    %17 = arith.truncf %16 : vector<8x256xf32> to vector<8x256xbf16>
    %c0_12 = arith.constant 0 : index
    %c0_13 = arith.constant 0 : index
    %18 = vector.load %arg6[%c0_12, %c0_13] : memref<256x512xbf16, #tpu.memory_space<vmem>>, vector<256x512xbf16>
    %cst_14 = arith.constant dense<0.000000e+00> : vector<8x512xf32>
    %19 = tpu.matmul %17, %18, %cst_14 {dimension_numbers = #tpu.dot_dimension_numbers<[1], [0], [0], [1], [0, 0, 1, 1], [], []>} : vector<8x256xbf16>, vector<256x512xbf16>, vector<8x512xf32> -> vector<8x512xf32>
    %c0_15 = arith.constant 0 : index
    %c0_16 = arith.constant 0 : index
    %20 = vector.load %arg7[%c0_15, %c0_16] : memref<1x512xf32, #tpu.memory_space<vmem>>, vector<1x512xf32>
    %21 = vector.broadcast %20 : vector<1x512xf32> to vector<8x512xf32>
    %22 = arith.addf %19, %21 : vector<8x512xf32>
    %cst_17 = arith.constant 0.000000e+00 : f32
    %23 = vector.broadcast %cst_17 : f32 to vector<8x512xf32>
    %24 = arith.maximumf %22, %23 : vector<8x512xf32>
    %25 = arith.truncf %24 : vector<8x512xf32> to vector<8x512xbf16>
    %c0_18 = arith.constant 0 : index
    %c0_19 = arith.constant 0 : index
    %26 = vector.load %arg8[%c0_18, %c0_19] : memref<512x256xbf16, #tpu.memory_space<vmem>>, vector<512x256xbf16>
    %cst_20 = arith.constant dense<0.000000e+00> : vector<8x256xf32>
    %27 = tpu.matmul %25, %26, %cst_20 {dimension_numbers = #tpu.dot_dimension_numbers<[1], [0], [0], [1], [0, 0, 1, 1], [], []>} : vector<8x512xbf16>, vector<512x256xbf16>, vector<8x256xf32> -> vector<8x256xf32>
    %c0_21 = arith.constant 0 : index
    %c0_22 = arith.constant 0 : index
    %28 = vector.load %arg9[%c0_21, %c0_22] : memref<1x256xf32, #tpu.memory_space<vmem>>, vector<1x256xf32>
    %29 = vector.broadcast %28 : vector<1x256xf32> to vector<8x256xf32>
    %30 = arith.addf %27, %29 : vector<8x256xf32>
    %cst_23 = arith.constant 0.000000e+00 : f32
    %31 = vector.broadcast %cst_23 : f32 to vector<8x256xf32>
    %32 = arith.maximumf %30, %31 : vector<8x256xf32>
    %33 = arith.truncf %32 : vector<8x256xf32> to vector<8x256xbf16>
    %c0_24 = arith.constant 0 : index
    %c0_25 = arith.constant 0 : index
    %34 = vector.load %arg10[%c0_24, %c0_25] : memref<256x128xbf16, #tpu.memory_space<vmem>>, vector<256x128xbf16>
    %cst_26 = arith.constant dense<0.000000e+00> : vector<8x128xf32>
    %35 = tpu.matmul %33, %34, %cst_26 {dimension_numbers = #tpu.dot_dimension_numbers<[1], [0], [0], [1], [0, 0, 1, 1], [], []>} : vector<8x256xbf16>, vector<256x128xbf16>, vector<8x128xf32> -> vector<8x128xf32>
    %c0_27 = arith.constant 0 : index
    %c0_28 = arith.constant 0 : index
    %36 = vector.load %arg11[%c0_27, %c0_28] : memref<1x128xf32, #tpu.memory_space<vmem>>, vector<1x128xf32>
    %37 = vector.broadcast %36 : vector<1x128xf32> to vector<8x128xf32>
    %38 = arith.addf %35, %37 : vector<8x128xf32>
    %cst_29 = arith.constant 0.000000e+00 : f32
    %39 = vector.broadcast %cst_29 : f32 to vector<8x128xf32>
    %40 = arith.maximumf %38, %39 : vector<8x128xf32>
    %c0_30 = arith.constant 0 : index
    %c0_31 = arith.constant 0 : index
    %41 = vector.load %arg12[%c0_30, %c0_31] : memref<1x128xf32, #tpu.memory_space<vmem>>, vector<1x128xf32>
    %42 = vector.broadcast %41 : vector<1x128xf32> to vector<8x128xf32>
    %43 = arith.mulf %40, %42 : vector<8x128xf32>
    %cst_32 = arith.constant dense<0.000000e+00> : vector<8xf32>
    %44 = vector.multi_reduction <add>, %43, %cst_32 [1] : vector<8x128xf32> to vector<8xf32>
    %45 = vector.shape_cast %44 : vector<8xf32> to vector<8x1xf32>
    %c0_33 = arith.constant 0 : index
    %c0_34 = arith.constant 0 : index
    %46 = vector.load %arg13[%c0_33, %c0_34] : memref<1x1xf32, #tpu.memory_space<vmem>>, vector<1x1xf32>
    %47 = vector.broadcast %46 : vector<1x1xf32> to vector<8x1xf32>
    %48 = arith.addf %45, %47 : vector<8x1xf32>
    %c0_35 = arith.constant 0 : index
    %c0_36 = arith.constant 0 : index
    %49 = vector.load %arg14[%c0_35, %c0_36] : memref<8x1xf32, #tpu.memory_space<vmem>>, vector<8x1xf32>
    tpu.vector_store %arg14[%c0_35, %c0_36], %48 {strides = array<i32>} : memref<8x1xf32, #tpu.memory_space<vmem>>, vector<8x1xf32>,
    return
  }
  func.func @transform_0(%arg0: i32) -> (i32, i32) {
    %c0_i32 = arith.constant 0 : i32
    %c0_i32_0 = arith.constant 0 : i32
    return %arg0, %c0_i32 : i32, i32
  }
  func.func @transform_1(%arg0: i32) -> (i32, i32) {
    %c0_i32 = arith.constant 0 : i32
    %c0_i32_0 = arith.constant 0 : i32
    %c0_i32_1 = arith.constant 0 : i32
    return %c0_i32, %c0_i32_0 : i32, i32
  }
  func.func @transform_2(%arg0: i32) -> (i32, i32) {
    %c0_i32 = arith.constant 0 : i32
    %c0_i32_0 = arith.constant 0 : i32
    %c0_i32_1 = arith.constant 0 : i32
    return %c0_i32, %c0_i32_0 : i32, i32
  }
  func.func @transform_3(%arg0: i32) -> (i32, i32) {
    %c0_i32 = arith.constant 0 : i32
    %c0_i32_0 = arith.constant 0 : i32
    %c0_i32_1 = arith.constant 0 : i32
    return %c0_i32, %c0_i32_0 : i32, i32
  }
  func.func @transform_4(%arg0: i32) -> (i32, i32) {
    %c0_i32 = arith.constant 0 : i32
    %c0_i32_0 = arith.constant 0 : i32
    %c0_i32_1 = arith.constant 0 : i32
    return %c0_i32, %c0_i32_0 : i32, i32
  }
  func.func @transform_5(%arg0: i32) -> (i32, i32) {
    %c0_i32 = arith.constant 0 : i32
    %c0_i32_0 = arith.constant 0 : i32
    %c0_i32_1 = arith.constant 0 : i32
    return %c0_i32, %c0_i32_0 : i32, i32
  }
  func.func @transform_6(%arg0: i32) -> (i32, i32) {
    %c0_i32 = arith.constant 0 : i32
    %c0_i32_0 = arith.constant 0 : i32
    %c0_i32_1 = arith.constant 0 : i32
    return %c0_i32, %c0_i32_0 : i32, i32
  }
  func.func @transform_7(%arg0: i32) -> (i32, i32) {
    %c0_i32 = arith.constant 0 : i32
    %c0_i32_0 = arith.constant 0 : i32
    %c0_i32_1 = arith.constant 0 : i32
    return %c0_i32, %c0_i32_0 : i32, i32
  }
  func.func @transform_8(%arg0: i32) -> (i32, i32) {
    %c0_i32 = arith.constant 0 : i32
    %c0_i32_0 = arith.constant 0 : i32
    %c0_i32_1 = arith.constant 0 : i32
    return %c0_i32, %c0_i32_0 : i32, i32
  }
  func.func @transform_9(%arg0: i32) -> (i32, i32) {
    %c0_i32 = arith.constant 0 : i32
    %c0_i32_0 = arith.constant 0 : i32
    %c0_i32_1 = arith.constant 0 : i32
    return %c0_i32, %c0_i32_0 : i32, i32
  }
  func.func @transform_10(%arg0: i32) -> (i32, i32) {
    %c0_i32 = arith.constant 0 : i32
    %c0_i32_0 = arith.constant 0 : i32
    %c0_i32_1 = arith.constant 0 : i32
    return %c0_i32, %c0_i32_0 : i32, i32
  }
  func.func @transform_11(%arg0: i32) -> (i32, i32) {
    %c0_i32 = arith.constant 0 : i32
    %c0_i32_0 = arith.constant 0 : i32
    %c0_i32_1 = arith.constant 0 : i32
    return %c0_i32, %c0_i32_0 : i32, i32
  }
  func.func @transform_12(%arg0: i32) -> (i32, i32) {
    %c0_i32 = arith.constant 0 : i32
    %c0_i32_0 = arith.constant 0 : i32
    %c0_i32_1 = arith.constant 0 : i32
    return %c0_i32, %c0_i32_0 : i32, i32
  }
  func.func @transform_13(%arg0: i32) -> (i32, i32) {
    %c0_i32 = arith.constant 0 : i32
    %c0_i32_0 = arith.constant 0 : i32
    return %arg0, %c0_i32 : i32, i32
  }
}

</mosaic_0001>

<bundles_post_ra>
// kernel: nn_forward.1
= control target key start
LH: loop header
LB: loop body
LE: loop exit
PB: predicated region body
PF: predicated region fallthrough
CT: control target
= control target key end

     0   :  { %s2345_s0 = inlined_call_operand.hbm [shape: f32[8,153], index: 0, kind: input, shape index: {}]   ;;  %s2346_s1 = inlined_call_operand.hbm [shape: bf16[153,128], index: 1, kind: input, shape index: {}]   ;;  %s2347_s2 = inlined_call_operand.vmem [shape: f32[1,128], index: 2, kind: input, shape index: {}]   ;;  %s2348_s3 = inlined_call_operand.hbm [shape: bf16[128,256], index: 3, kind: input, shape index: {}]   ;;  %s2349_s4 = inlined_call_operand.vmem [shape: f32[1,256], index: 4, kind: input, shape index: {}]   ;;  %s2350_s5 = inlined_call_operand.hbm [shape: bf16[256,512], index: 5, kind: input, shape index: {}]   ;;  %s2351_s6 = inlined_call_operand.vmem [shape: f32[1,512], index: 6, kind: input, shape index: {}]   ;;  %s2352_s7 = inlined_call_operand.hbm [shape: bf16[512,256], index: 7, kind: input, shape index: {}]   ;;  %s2353_s8 = inlined_call_operand.vmem [shape: f32[1,256], index: 8, kind: input, shape index: {}]   ;;  %s2354_s9 = inlined_call_operand.hbm [shape: bf16[256,128], index: 9, kind: input, shape index: {}]   ;;  %s2355_s10 = inlined_call_operand.vmem [shape: f32[1,128], index: 10, kind: input, shape index: {}]   ;;  %s2356_s11 = inlined_call_operand.vmem [shape: f32[1,128], index: 11, kind: input, shape index: {}]   ;;  %s2357_s12 = inlined_call_operand.<no memory space> [shape: f32[1,1], index: 12, kind: input, shape index: {}]   ;;  %s2358_s13 = inlined_call_operand.vmem [shape: f32[8,1], index: 13, kind: output, shape index: {}]  }
   0x1   :  { %v18_v0 = vstv %s2357_s12 }
   0x2   :  { %19 = vst [vmem:[#allocation2] sm:$0x1] %v18_v0 }
   0x3   :  { %20 = vsyncpa [#allocation4], 0 }
   0x4   :  { %21 = vsyncpa [#allocation6], 0 }
   0x5   :  { %22 = vsyncpa [#allocation9], 0 }
   0x6   :  { %23 = vsyncpa [#allocation12], 0  ;;  %s2186_s27 = smov [#allocation5]  }
   0x7   :  { %s39_s28 = sshll.u32 %s2186_s27, 4  ;;  %s40_s28 = int_to_ptr.vmem [resolvable:$true] %s39_s28 }
   0x8   :  { %s2066_s29 = scalar_lea.vmem %s40_s28, 1280  ;;  %p2071_p1 = scmp.lt.s32.totalorder %s40_s28, %s40_s28 }
   0x9   :  { %p2067_p0 = scmp.ne.s32.totalorder %s40_s28, %s2066_s29  ;;  %p2072_p2 = scmp.lt.s32.totalorder %s2066_s29, %s2066_s29 }
   0xb   :  { %p2073_p3 = por %p2072_p2, %p2071_p1 }
   0xd   :  { %p2074_p4 = pnand %p2073_p3, %p2067_p0 }
   0xf   :  { %2077 = shalt.err (!%p2074_p4)
}
  0x10   :  { %s2187_s30 = smov 64   ;;  %s2188_s14 = smov 4  }
  0x11   :  { %45 = dma.hbm_to_vmem [thread:$0]  %s2346_s1, 1280, %s40_s28, [#allocation6], %s2187_s30, %s2187_s30, %s2188_s14  }
  0x12   :  { %s2189_s16 = smov [#allocation8]  }
  0x13   :  { %s67_s17 = sshll.u32 %s2189_s16, 4  ;;  %s68_s17 = int_to_ptr.vmem [resolvable:$true] %s67_s17 }
  0x14   :  { %s2086_s18 = scalar_lea.vmem %s68_s17, 8192  ;;  %p2091_p6 = scmp.lt.s32.totalorder %s68_s17, %s68_s17 }
  0x15   :  { %p2087_p5 = scmp.ne.s32.totalorder %s68_s17, %s2086_s18  ;;  %p2092_p7 = scmp.lt.s32.totalorder %s2086_s18, %s2086_s18 }
  0x17   :  { %p2093_p8 = por %p2092_p7, %p2091_p6 }
  0x19   :  { %p2094_p9 = pnand %p2093_p8, %p2087_p5 }
  0x1b   :  { %2097 = shalt.err (!%p2094_p9)
}
  0x1c   :  { %s2190_s19 = smov 256   ;;  %s2191_s20 = smov 16  }
  0x1d   :  { %73 = dma.hbm_to_vmem [thread:$0]  %s2350_s5, 8192, %s68_s17, [#allocation9], %s2190_s19, %s2190_s19, %s2191_s20  }
  0x1e   :  { %s2192_s23 = smov [#allocation3]   ;;  %s2193_s25 = smov [#allocation7]  }
  0x1f   :  { %s30_s24 = sshll.u32 %s2192_s23, 4  ;;  %s53_s1 = sshll.u32 %s2193_s25, 4  ;;  %s31_s24 = int_to_ptr.vmem [resolvable:$true] %s30_s24  ;;  %s54_s1 = int_to_ptr.vmem [resolvable:$true] %s53_s1 }
  0x20   :  { %s2106_s26 = scalar_lea.vmem %s31_s24, 256  ;;  %p2111_p11 = scmp.lt.s32.totalorder %s31_s24, %s31_s24 }
  0x21   :  { %p2107_p10 = scmp.ne.s32.totalorder %s31_s24, %s2106_s26  ;;  %p2112_p12 = scmp.lt.s32.totalorder %s2106_s26, %s2106_s26 }
  0x23   :  { %p2113_p13 = por %p2112_p12, %p2111_p11 }
  0x25   :  { %p2114_p0 = pnand %p2113_p13, %p2107_p10 }
  0x27   :  { %2117 = shalt.err (!%p2114_p0)
}
  0x28   :  { %33 = dma.hbm_to_vmem [thread:$0]  %s2345_s0, 256, %s31_s24, [#allocation4]  }
  0x29   :  { %s2126_s29 = scalar_lea.vmem %s54_s1, 2048  ;;  %p2131_p2 = scmp.lt.s32.totalorder %s54_s1, %s54_s1 }
  0x2a   :  { %p2127_p1 = scmp.ne.s32.totalorder %s54_s1, %s2126_s29  ;;  %p2132_p3 = scmp.lt.s32.totalorder %s2126_s29, %s2126_s29 }
  0x2c   :  { %p2133_p4 = por %p2132_p3, %p2131_p2 }
  0x2e   :  { %p2134_p5 = pnand %p2133_p4, %p2127_p1 }
  0x30   :  { %2137 = shalt.err (!%p2134_p5)
}
  0x31   :  { %s2194_s5 = smov 128   ;;  %s2195_s12 = smov 8  }
  0x32   :  { %59 = dma.hbm_to_vmem [thread:$0]  %s2348_s3, 2048, %s54_s1, [#allocation6], %s2194_s5, %s2194_s5, %s2195_s12  }
  0x33   :  { %s2196_s17 = smov [#allocation10]   ;;  %s2197_s19 = smov [#allocation11]  }
  0x34   :  { %s81_s18 = sshll.u32 %s2196_s17, 4  ;;  %s95_s20 = sshll.u32 %s2197_s19, 4  ;;  %s82_s18 = int_to_ptr.vmem [resolvable:$true] %s81_s18  ;;  %s96_s20 = int_to_ptr.vmem [resolvable:$true] %s95_s20 }
  0x35   :  { %s2146_s0 = scalar_lea.vmem %s82_s18, 8192  ;;  %p2151_p7 = scmp.lt.s32.totalorder %s82_s18, %s82_s18 }
  0x36   :  { %p2147_p6 = scmp.ne.s32.totalorder %s82_s18, %s2146_s0  ;;  %p2152_p8 = scmp.lt.s32.totalorder %s2146_s0, %s2146_s0 }
  0x38   :  { %p2153_p9 = por %p2152_p8, %p2151_p7 }
  0x3a   :  { %p2154_p10 = pnand %p2153_p9, %p2147_p6 }
  0x3c   :  { %2157 = shalt.err (!%p2154_p10)
}
  0x3d   :  { %87 = dma.hbm_to_vmem [thread:$0]  %s2352_s7, 8192, %s82_s18, [#allocation9], %s2194_s5, %s2194_s5, %s2195_s12  }
  0x3e   :  { %s2166_s23 = scalar_lea.vmem %s96_s20, 2048  ;;  %p2171_p12 = scmp.lt.s32.totalorder %s96_s20, %s96_s20 }
  0x3f   :  { %p2167_p11 = scmp.ne.s32.totalorder %s96_s20, %s2166_s23  ;;  %p2172_p13 = scmp.lt.s32.totalorder %s2166_s23, %s2166_s23 }
  0x41   :  { %p2173_p0 = por %p2172_p13, %p2171_p12 }
  0x43   :  { %p2174_p1 = pnand %p2173_p0, %p2167_p11 }
  0x45   :  { %2177 = shalt.err (!%p2174_p1)
}
  0x46   :  { %101 = dma.hbm_to_vmem [thread:$0]  %s2354_s9, 2048, %s96_s20, [#allocation12], %s2187_s30, %s2187_s30, %s2188_s14  }
  0x47   :  { %2178 = dma.done.wait [#allocation4], 256  }
  0x48   :  { %2179 = vsyncadd [#allocation4], 4294967040 }
  0x49   :  { %2180 = dma.done.wait [#allocation6], 3328  }
  0x4a   :  { %2181 = vsyncadd [#allocation6], 4294963968 }
  0x4b   :  { %2182 = dma.done.wait [#allocation9], 16384  }
  0x4c   :  { %2183 = vsyncadd [#allocation9], 4294950912 }
  0x4d   :  { %2184 = dma.done.wait [#allocation12], 2048  }
  0x4e   :  { %2185 = vsyncadd [#allocation12], 4294965248  ;;  %v2198_v1 = vmov 0   ;;  %v1816_v2 = vld [vmem:[#allocation5 + $0x38] sm:$0xff]   ;;  %v1817_v3 = vld [vmem:[#allocation5 + $0x30] sm:$0xff]   ;;  %vm217_vm0 = vcmask 203776  }
  0x4f   :  { %228 = vmatprep.subr.bf16.mxu0 %v2198_v1  ;;  %410 = vmatprep.mubr.bf16.mxu1 %v2198_v1  ;;  %v1818_v4 = vld [vmem:[#allocation5 + $0x28] sm:$0xff]   ;;  %v1819_v5 = vld [vmem:[#allocation5 + $0x20] sm:$0xff]   ;;  %v128_v6 = vld [vmem:[#allocation3 + $0x8] sm:$0xff]  ;;  %vm221_vm1 = vcmask 1043456   ;;  %vm222_vm2 = vcmask 1044480   ;;  %v2199_v22 = vmov 65535  }
  0x50   :  { %229 = vmatpush1.bf16.msra.mxu0 %v1816_v2  ;;  %v130_v7 = vpack.c.bf16 %v128_v6, %v128_v6  ;;  %v1826_v8 = vld [vmem:[#allocation7 + $0x74] ss:$8 sps:$4 sm:$0xff]   ;;  %v1828_v9 = vld [vmem:[#allocation7 + $0x70] ss:$8 sps:$4 sm:$0xff]   ;;  %v1829_v10 = vld [vmem:[#allocation7 + $0x64] ss:$8 sps:$4 sm:$0xff]  }
  0x51   :  { %230 = vmatprep.subr.bf16.mxu0 %v2198_v1  ;;  %378 = vmatprep.subr.bf16.mxu1 %v1826_v8  ;;  %v1820_v11 = vld [vmem:[#allocation5 + $0x18] sm:$0xff]   ;;  %v1832_v13 = vld [vmem:[#allocation7 + $0x54] ss:$8 sps:$4 sm:$0xff]   ;;  %v1821_v14 = vld [vmem:[#allocation5 + $0x10] sm:$0xff]   ;;  %v223_v23 = vsel %vm221_vm1, 4294967295, %v2199_v22  ;;  %vm1595_vm3 = vcmask 7168  }
  0x52   :  { %1616 = vmatprep.mubr.msk.bf16.mxu0 %vm217_vm0, %v130_v7  ;;  %379 = vmatpush1.bf16.msra.mxu1 %v1828_v9  ;;  %v1831_v12 = vld [vmem:[#allocation7 + $0x60] ss:$8 sps:$4 sm:$0xff]   ;;  %v1834_v15 = vld [vmem:[#allocation7 + $0x50] ss:$8 sps:$4 sm:$0xff]   ;;  %v1835_v16 = vld [vmem:[#allocation7 + $0x44] ss:$8 sps:$4 sm:$0xff]  }
  0x53   :  { %380 = vmatprep.subr.bf16.mxu1 %v1829_v10  ;;  %v1822_v17 = vld [vmem:[#allocation5 + $0x8] sm:$0xff]   ;;  %v1837_v18 = vld [vmem:[#allocation7 + $0x40] ss:$8 sps:$4 sm:$0xff]   ;;  %v1823_v20 = vld [vmem:[#allocation5] sm:$0xff]   ;;  %v224_v26 = vsel %vm222_vm2, %v223_v23, 0 }
  0x54   :  { %231 = vmatpush1.bf16.msra.mxu0 %v1817_v3  ;;  %v1838_v19 = vld [vmem:[#allocation7 + $0x34] ss:$8 sps:$4 sm:$0xff]   ;;  %v1840_v24 = vld [vmem:[#allocation7 + $0x30] ss:$8 sps:$4 sm:$0xff]   ;;  %v1841_v25 = vld [vmem:[#allocation7 + $0x24] ss:$8 sps:$4 sm:$0xff]  }
  0x55   :  { %232 = vmatprep.subr.bf16.mxu0 %v2198_v1  ;;  %v1824_v21 = vld [vmem:[#allocation5 + $0x48] sm:$0x1f]   ;;  %v1843_v27 = vld [vmem:[#allocation7 + $0x20] ss:$8 sps:$4 sm:$0xff]   ;;  %v1825_v30 = vld [vmem:[#allocation5 + $0x40] sm:$0xff]  }
  0x56   :  { %381 = vmatpush1.bf16.msra.mxu1 %v1831_v12  ;;  %v1844_v28 = vld [vmem:[#allocation7 + $0x14] ss:$8 sps:$4 sm:$0xff]   ;;  %v226_v29 = vand.u32 %v1824_v21, %v224_v26  ;;  %v127_v31 = vld [vmem:[#allocation3] sm:$0xff]  ;;  %v1846_v33 = vld [vmem:[#allocation7 + $0x10] ss:$8 sps:$4 sm:$0xff]  }
  0x57   :  { %382 = vmatprep.subr.bf16.mxu1 %v1832_v13  ;;  %v129_v32 = vpack.c.bf16 %v127_v31, %v127_v31  ;;  %v1847_v34 = vld [vmem:[#allocation7 + $0x4] ss:$8 sps:$4 sm:$0xff]   ;;  %v1849_v35 = vld [vmem:[#allocation7] ss:$8 sps:$4 sm:$0xff]  }
  0x58   :  { %233 = vmatpush1.bf16.msra.mxu0 %v1818_v4  ;;  %v1852_v36 = vld [vmem:[#allocation8 + $0xe4] ss:$16 sps:$4 sm:$0xff]   ;;  %v1853_v37 = vld [vmem:[#allocation8 + $0xe8] ss:$16 sps:$4 sm:$0xff]   ;;  %v1855_v38 = vld [vmem:[#allocation8 + $0xec] ss:$16 sps:$4 sm:$0xff]  }
  0x59   :  { %234 = vmatprep.subr.bf16.mxu0 %v2198_v1  ;;  %v1861_v39 = vld [vmem:[#allocation8 + $0xcc] ss:$16 sps:$4 sm:$0xff]   ;;  %v1859_v40 = vld [vmem:[#allocation8 + $0xc8] ss:$16 sps:$4 sm:$0xff]   ;;  %v1850_v7 = vld [vmem:[#allocation8 + $0xe0] ss:$16 sps:$4 sm:$0xff]  }
  0x5a   :  { %383 = vmatpush1.bf16.msra.mxu1 %v1834_v15  ;;  %v1867_v41 = vld [vmem:[#allocation8 + $0xac] ss:$16 sps:$4 sm:$0xff]   ;;  %v1865_v42 = vld [vmem:[#allocation8 + $0xa8] ss:$16 sps:$4 sm:$0xff]   ;;  %v1858_v9 = vld [vmem:[#allocation8 + $0xc4] ss:$16 sps:$4 sm:$0xff]  }
  0x5b   :  { %384 = vmatprep.subr.bf16.mxu1 %v1835_v16  ;;  %v1873_v43 = vld [vmem:[#allocation8 + $0x8c] ss:$16 sps:$4 sm:$0xff]   ;;  %v1871_v44 = vld [vmem:[#allocation8 + $0x88] ss:$16 sps:$4 sm:$0xff]   ;;  %v1864_v12 = vld [vmem:[#allocation8 + $0xa4] ss:$16 sps:$4 sm:$0xff]  }
  0x5c   :  { %235 = vmatpush1.bf16.msra.mxu0 %v1819_v5  ;;  %v1879_v45 = vld [vmem:[#allocation8 + $0x6c] ss:$16 sps:$4 sm:$0xff]   ;;  %v1877_v46 = vld [vmem:[#allocation8 + $0x68] ss:$16 sps:$4 sm:$0xff]   ;;  %v1862_v13 = vld [vmem:[#allocation8 + $0xa0] ss:$16 sps:$4 sm:$0xff]  }
  0x5d   :  { %236 = vmatprep.subr.bf16.mxu0 %v2198_v1  ;;  %v1885_v47 = vld [vmem:[#allocation8 + $0x4c] ss:$16 sps:$4 sm:$0xff]   ;;  %v1883_v48 = vld [vmem:[#allocation8 + $0x48] ss:$16 sps:$4 sm:$0xff]   ;;  %v1868_v15 = vld [vmem:[#allocation8 + $0x80] ss:$16 sps:$4 sm:$0xff]  }
  0x5e   :  { %385 = vmatpush1.bf16.msra.mxu1 %v1837_v18  ;;  %v1891_v49 = vld [vmem:[#allocation8 + $0x2c] ss:$16 sps:$4 sm:$0xff]   ;;  %v1889_v50 = vld [vmem:[#allocation8 + $0x28] ss:$16 sps:$4 sm:$0xff]   ;;  %v1876_v16 = vld [vmem:[#allocation8 + $0x64] ss:$16 sps:$4 sm:$0xff]  }
  0x5f   :  { %386 = vmatprep.subr.bf16.mxu1 %v1838_v19  ;;  %v1897_v51 = vld [vmem:[#allocation8 + $0xc] ss:$16 sps:$4 sm:$0xff]   ;;  %v1895_v52 = vld [vmem:[#allocation8 + $0x8] ss:$16 sps:$4 sm:$0xff]   ;;  %v1882_v18 = vld [vmem:[#allocation8 + $0x44] ss:$16 sps:$4 sm:$0xff]  }
  0x60   :  { %237 = vmatpush1.bf16.msra.mxu0 %v1820_v11  ;;  %v1903_v53 = vld [vmem:[#allocation8 + $0x1ec] ss:$16 sps:$4 sm:$0xff]   ;;  %v1901_v54 = vld [vmem:[#allocation8 + $0x1e8] ss:$16 sps:$4 sm:$0xff]   ;;  %v1856_v11 = vld [vmem:[#allocation8 + $0xc0] ss:$16 sps:$4 sm:$0xff]  }
  0x61   :  { %238 = vmatprep.subr.bf16.mxu0 %v2198_v1  ;;  %v1909_v55 = vld [vmem:[#allocation8 + $0x1cc] ss:$16 sps:$4 sm:$0xff]   ;;  %v1907_v56 = vld [vmem:[#allocation8 + $0x1c8] ss:$16 sps:$4 sm:$0xff]   ;;  %v1880_v19 = vld [vmem:[#allocation8 + $0x40] ss:$16 sps:$4 sm:$0xff]  }
  0x62   :  { %387 = vmatpush1.bf16.msra.mxu1 %v1840_v24  ;;  %v1915_v57 = vld [vmem:[#allocation8 + $0x1ac] ss:$16 sps:$4 sm:$0xff]   ;;  %v1913_v58 = vld [vmem:[#allocation8 + $0x1a8] ss:$16 sps:$4 sm:$0xff]   ;;  %v1886_v21 = vld [vmem:[#allocation8 + $0x20] ss:$16 sps:$4 sm:$0xff]  }
  0x63   :  { %388 = vmatprep.subr.bf16.mxu1 %v1841_v25  ;;  %v1921_v59 = vld [vmem:[#allocation8 + $0x18c] ss:$16 sps:$4 sm:$0xff]   ;;  %v1919_v60 = vld [vmem:[#allocation8 + $0x188] ss:$16 sps:$4 sm:$0xff]   ;;  %v1894_v22 = vld [vmem:[#allocation8 + $0x4] ss:$16 sps:$4 sm:$0xff]  }
  0x64   :  { %239 = vmatpush1.bf16.msra.mxu0 %v1821_v14  ;;  %v1927_v61 = vld [vmem:[#allocation8 + $0x16c] ss:$16 sps:$4 sm:$0xff]   ;;  %v1925_v62 = vld [vmem:[#allocation8 + $0x168] ss:$16 sps:$4 sm:$0xff]   ;;  %v1870_v14 = vld [vmem:[#allocation8 + $0x84] ss:$16 sps:$4 sm:$0xff]  }
  0x65   :  { %240 = vmatprep.subr.bf16.mxu0 %v2198_v1  ;;  %v1933_v63 = vld [vmem:[#allocation8 + $0x14c] ss:$16 sps:$4 sm:$0xff]   ;;  %v1931_v0 = vld [vmem:[#allocation8 + $0x148] ss:$16 sps:$4 sm:$0xff]   ;;  %v1892_v23 = vld [vmem:[#allocation8] ss:$16 sps:$4 sm:$0xff]  }
  0x66   :  { %389 = vmatpush1.bf16.msra.mxu1 %v1843_v27  ;;  %v1900_v24 = vld [vmem:[#allocation8 + $0x1e4] ss:$16 sps:$4 sm:$0xff]   ;;  %v1898_v25 = vld [vmem:[#allocation8 + $0x1e0] ss:$16 sps:$4 sm:$0xff]  }
  0x67   :  { %390 = vmatprep.subr.bf16.mxu1 %v1844_v28  ;;  %v1906_v26 = vld [vmem:[#allocation8 + $0x1c4] ss:$16 sps:$4 sm:$0xff]   ;;  %v1904_v27 = vld [vmem:[#allocation8 + $0x1c0] ss:$16 sps:$4 sm:$0xff]  }
  0x68   :  { %241 = vmatpush1.bf16.msra.mxu0 %v1822_v17  ;;  %v1874_v17 = vld [vmem:[#allocation8 + $0x60] ss:$16 sps:$4 sm:$0xff]   ;;  %v1912_v28 = vld [vmem:[#allocation8 + $0x1a4] ss:$16 sps:$4 sm:$0xff]  }
  0x69   :  { %242 = vmatprep.subr.bf16.mxu0 %v2198_v1  ;;  %v1916_v31 = vld [vmem:[#allocation8 + $0x180] ss:$16 sps:$4 sm:$0xff]  }
  0x6a   :  { %391 = vmatpush1.bf16.msra.mxu1 %v1846_v33  ;;  %v1922_v33 = vld [vmem:[#allocation8 + $0x160] ss:$16 sps:$4 sm:$0xff]  }
  0x6b   :  { %392 = vmatprep.subr.bf16.mxu1 %v1847_v34  ;;  %v1930_v34 = vld [vmem:[#allocation8 + $0x144] ss:$16 sps:$4 sm:$0xff]  }
  0x6c   :  { %243 = vmatpush1.bf16.msra.mxu0 %v1823_v20  ;;  %v1888_v20 = vld [vmem:[#allocation8 + $0x24] ss:$16 sps:$4 sm:$0xff]  }
  0x6d   :  { %256 = vmatprep.subr.bf16.mxu0 %v2198_v1 }
  0x6e   :  { %393 = vmatpush1.bf16.msra.mxu1 %v1849_v35  ;;  %v1928_v35 = vld [vmem:[#allocation8 + $0x140] ss:$16 sps:$4 sm:$0xff]  }
  0x6f   :  { %829 = vmatprep.subr.bf16.mxu1 %v1852_v36  ;;  %v1936_v36 = vld [vmem:[#allocation8 + $0x124] ss:$16 sps:$4 sm:$0xff]  }
  0x70   :  { %257 = vmatpush2.bf16.msra.mxu0 %v226_v29  ;;  %v1910_v29 = vld [vmem:[#allocation8 + $0x1a0] ss:$16 sps:$4 sm:$0xff]  }
  0x71   :  { %258 = vmatprep.subr.bf16.mxu0 %v2198_v1  ;;  %v1605_v1 = vld [vmem:[%s2347_s2] ss:$0 sm:$0xff] }
  0x74   :  { %259 = vmatpush2.bf16.msra.mxu0 %v1825_v30  ;;  %v1918_v30 = vld [vmem:[#allocation8 + $0x184] ss:$16 sps:$4 sm:$0xff]  }
  0x75   :  { %870 = vmatprep.subr.bf16.mxu0 %v1855_v38  ;;  %v1934_v38 = vld [vmem:[#allocation8 + $0x120] ss:$16 sps:$4 sm:$0xff]  }
  0x77   :  { %261 = vmatmul.mubr.bf16.vlgmr.msra.gmra.mxu0 %v129_v32  ;;  %v1924_v32 = vld [vmem:[#allocation8 + $0x164] ss:$16 sps:$4 sm:$0xff]  }
  0x78   :  { %871 = vmatpush1.bf16.msra.mxu0 %v1853_v37  ;;  %v1939_v37 = vld [vmem:[#allocation8 + $0x12c] ss:$16 sps:$4 sm:$0xff]  }
  0x79   :  { %872 = vmatprep.subr.bf16.mxu0 %v1861_v39  ;;  %v1937_v39 = vld [vmem:[#allocation8 + $0x128] ss:$16 sps:$4 sm:$0xff]  }
  0x7c   :  { %873 = vmatpush1.bf16.msra.mxu0 %v1859_v40  ;;  %v1942_v40 = vld [vmem:[#allocation8 + $0x104] ss:$16 sps:$4 sm:$0xff]  }
  0x7d   :  { %874 = vmatprep.subr.bf16.mxu0 %v1867_v41  ;;  %v1945_v41 = vld [vmem:[#allocation8 + $0x10c] ss:$16 sps:$4 sm:$0xff]  }
  0x80   :  { %875 = vmatpush1.bf16.msra.mxu0 %v1865_v42  ;;  %v1940_v42 = vld [vmem:[#allocation8 + $0x100] ss:$16 sps:$4 sm:$0xff]  }
  0x81   :  { %876 = vmatprep.subr.bf16.mxu0 %v1873_v43  ;;  %v1943_v43 = vld [vmem:[#allocation8 + $0x108] ss:$16 sps:$4 sm:$0xff]  }
  0x84   :  { %877 = vmatpush1.bf16.msra.mxu0 %v1871_v44  ;;  %v1948_v44 = vld [vmem:[#allocation10 + $0x74] ss:$8 sps:$4 sm:$0xff]  }
  0x85   :  { %878 = vmatprep.subr.bf16.mxu0 %v1879_v45  ;;  %v1951_v45 = vld [vmem:[#allocation10 + $0x174] ss:$8 sps:$4 sm:$0xff]  }
  0x88   :  { %879 = vmatpush1.bf16.msra.mxu0 %v1877_v46  ;;  %v288_v46 = vlaneseq }
  0x89   :  { %880 = vmatprep.subr.bf16.mxu0 %v1885_v47 }
  0x8a   :  { %v2311_v47 = vshrl.u32 %v288_v46, 7  ;;  %v2023_v46 = vld [vmem:[#allocation10 + $0x1b4] ss:$8 sps:$4 sm:$0xff]  }
  0x8c   :  { %881 = vmatpush1.bf16.msra.mxu0 %v1883_v48  ;;  %v2314_v48 = vsub.s32 0, %v2311_v47 }
  0x8d   :  { %882 = vmatprep.subr.bf16.mxu0 %v1891_v49  ;;  %v286_v49 = vld [vmem:[%s2349_s4] sm:$0x3] }
  0x90   :  { %883 = vmatpush1.bf16.msra.mxu0 %v1889_v50  ;;  %v2320_v50 = vsub.s32 1, %v2311_v47 }
  0x91   :  { %884 = vmatprep.subr.bf16.mxu0 %v1897_v51  ;;  %v291_v51 = vrot.slane %v286_v49, %v2314_v48 }
  0x94   :  { %885 = vmatpush1.bf16.msra.mxu0 %v1895_v52  ;;  %v295_v52 = vrot.slane %v286_v49, %v2320_v50  ;;  %v2018_v49 = vld [vmem:[#allocation10 + $0xb0] ss:$8 sps:$4 sm:$0xff]  }
  0x95   :  { %886 = vmatprep.subr.bf16.mxu0 %v1903_v53 }
  0x98   :  { %887 = vmatpush2.bf16.msra.mxu0 %v1901_v54 }
  0x99   :  { %888 = vmatprep.subr.bf16.mxu0 %v1909_v55 }
  0x9c   :  { %889 = vmatpush2.bf16.msra.mxu0 %v1907_v56 }
  0x9d   :  { %890 = vmatprep.subr.bf16.mxu0 %v1915_v57 }
  0xa0   :  { %891 = vmatpush2.bf16.msra.mxu0 %v1913_v58 }
  0xa1   :  { %892 = vmatprep.subr.bf16.mxu0 %v1921_v59 }
  0xa4   :  { %893 = vmatpush2.bf16.msra.mxu0 %v1919_v60 }
  0xa5   :  { %894 = vmatprep.subr.bf16.mxu0 %v1927_v61 }
  0xa8   :  { %895 = vmatpush2.bf16.msra.mxu0 %v1925_v62  ;;  %v1946_v62 = vld [vmem:[#allocation10 + $0x70] ss:$8 sps:$4 sm:$0xff]  }
  0xa9   :  { %896 = vmatprep.subr.bf16.mxu0 %v1933_v63  ;;  %v1949_v63 = vld [vmem:[#allocation10 + $0x170] ss:$8 sps:$4 sm:$0xff]  }
  0xac   :  { %897 = vmatpush2.bf16.msra.mxu0 %v1931_v0 }
  0xad   :  { %898 = vmatprep.subr.bf16.mxu0 %v1939_v37  ;;  %v2008_v37 = vld [vmem:[#allocation10 + $0xd4] ss:$8 sps:$4 sm:$0xff]  }
  0xb0   :  { %899 = vmatpush2.bf16.msra.mxu0 %v1937_v39  ;;  %v2006_v39 = vld [vmem:[#allocation10 + $0xd0] ss:$8 sps:$4 sm:$0xff]  }
  0xb1   :  { %900 = vmatprep.subr.bf16.mxu0 %v1945_v41  ;;  %v2014_v41 = vld [vmem:[#allocation10 + $0xc4] ss:$8 sps:$4 sm:$0xff]  }
  0xb4   :  { %901 = vmatpush2.bf16.msra.mxu0 %v1943_v43  ;;  %v2012_v43 = vld [vmem:[#allocation10 + $0xc0] ss:$8 sps:$4 sm:$0xff]  }
  0xb5   :  { %1356 = vmatprep.subr.bf16.mxu0 %v1951_v45  ;;  %v2020_v45 = vld [vmem:[#allocation10 + $0xb4] ss:$8 sps:$4 sm:$0xff]  }
 0x137   :  { %v262_v2 = vpop.f32.mrf.mxu0 }
 0x138   :  { %v263_v3 = vadd.f32 %v1605_v1, %v262_v2  ;;  %v1954_v1 = vld [vmem:[#allocation10 + $0x64] ss:$8 sps:$4 sm:$0xff]  }
 0x139   :  { %v264_v4 = vpop.f32.mrf.mxu0  ;;  %v1957_v2 = vld [vmem:[#allocation10 + $0x164] ss:$8 sps:$4 sm:$0xff]  }
 0x13a   :  { %v268_v5 = vmax.f32 %v263_v3, 0.0  ;;  %v1952_v3 = vld [vmem:[#allocation10 + $0x60] ss:$8 sps:$4 sm:$0xff]  }
 0x13b   :  { %v265_v6 = vpop.f32.mrf.mxu0  ;;  %v1955_v4 = vld [vmem:[#allocation10 + $0x160] ss:$8 sps:$4 sm:$0xff]  }
 0x13c   :  { %v269_v8 = vpack.c.bf16 %v268_v5, %v268_v5  ;;  %v1960_v5 = vld [vmem:[#allocation10 + $0x54] ss:$8 sps:$4 sm:$0xff]  }
 0x13d   :  { %v266_v10 = vpop.f32.mrf.mxu0  ;;  %v1963_v6 = vld [vmem:[#allocation10 + $0x154] ss:$8 sps:$4 sm:$0xff]  }
 0x13e   :  { %411 = vmatmul.mubr.bf16.vlgmr.msra.gmra.mxu1 %v269_v8  ;;  %v1961_v8 = vld [vmem:[#allocation10 + $0x150] ss:$8 sps:$4 sm:$0xff]   ;;  %v1969_v10 = vld [vmem:[#allocation10 + $0x144] ss:$8 sps:$4 sm:$0xff]  }
 0x13f   :  { %830 = vmatpush1.bf16.msra.mxu1 %v1850_v7  ;;  %v1958_v7 = vld [vmem:[#allocation10 + $0x50] ss:$8 sps:$4 sm:$0xff]  }
 0x140   :  { %831 = vmatprep.subr.bf16.mxu1 %v1858_v9  ;;  %v1966_v9 = vld [vmem:[#allocation10 + $0x44] ss:$8 sps:$4 sm:$0xff]  }
 0x143   :  { %832 = vmatpush1.bf16.msra.mxu1 %v1856_v11  ;;  %v1964_v11 = vld [vmem:[#allocation10 + $0x40] ss:$8 sps:$4 sm:$0xff]  }
 0x144   :  { %833 = vmatprep.subr.bf16.mxu1 %v1864_v12  ;;  %v1967_v12 = vld [vmem:[#allocation10 + $0x140] ss:$8 sps:$4 sm:$0xff]  }
 0x147   :  { %834 = vmatpush1.bf16.msra.mxu1 %v1862_v13  ;;  %v1972_v13 = vld [vmem:[#allocation10 + $0x34] ss:$8 sps:$4 sm:$0xff]  }
 0x148   :  { %835 = vmatprep.subr.bf16.mxu1 %v1870_v14  ;;  %v1975_v14 = vld [vmem:[#allocation10 + $0x134] ss:$8 sps:$4 sm:$0xff]  }
 0x14b   :  { %836 = vmatpush1.bf16.msra.mxu1 %v1868_v15  ;;  %v1970_v15 = vld [vmem:[#allocation10 + $0x30] ss:$8 sps:$4 sm:$0xff]  }
 0x14c   :  { %837 = vmatprep.subr.bf16.mxu1 %v1876_v16  ;;  %v1973_v16 = vld [vmem:[#allocation10 + $0x130] ss:$8 sps:$4 sm:$0xff]  }
 0x14f   :  { %838 = vmatpush1.bf16.msra.mxu1 %v1874_v17  ;;  %v1978_v17 = vld [vmem:[#allocation10 + $0x24] ss:$8 sps:$4 sm:$0xff]  }
 0x150   :  { %839 = vmatprep.subr.bf16.mxu1 %v1882_v18  ;;  %v1981_v18 = vld [vmem:[#allocation10 + $0x124] ss:$8 sps:$4 sm:$0xff]  }
 0x153   :  { %840 = vmatpush1.bf16.msra.mxu1 %v1880_v19  ;;  %v1976_v19 = vld [vmem:[#allocation10 + $0x20] ss:$8 sps:$4 sm:$0xff]  }
 0x154   :  { %841 = vmatprep.subr.bf16.mxu1 %v1888_v20  ;;  %v1979_v20 = vld [vmem:[#allocation10 + $0x120] ss:$8 sps:$4 sm:$0xff]  }
 0x157   :  { %842 = vmatpush1.bf16.msra.mxu1 %v1886_v21  ;;  %v1984_v21 = vld [vmem:[#allocation10 + $0x14] ss:$8 sps:$4 sm:$0xff]  }
 0x158   :  { %843 = vmatprep.subr.bf16.mxu1 %v1894_v22  ;;  %v1987_v22 = vld [vmem:[#allocation10 + $0x114] ss:$8 sps:$4 sm:$0xff]  }
 0x15b   :  { %844 = vmatpush1.bf16.msra.mxu1 %v1892_v23  ;;  %v1982_v23 = vld [vmem:[#allocation10 + $0x10] ss:$8 sps:$4 sm:$0xff]  }
 0x15c   :  { %845 = vmatprep.subr.bf16.mxu1 %v1900_v24  ;;  %v1985_v24 = vld [vmem:[#allocation10 + $0x110] ss:$8 sps:$4 sm:$0xff]  }
 0x15f   :  { %846 = vmatpush2.bf16.msra.mxu1 %v1898_v25  ;;  %v1990_v25 = vld [vmem:[#allocation10 + $0x4] ss:$8 sps:$4 sm:$0xff]  }
 0x160   :  { %847 = vmatprep.subr.bf16.mxu1 %v1906_v26  ;;  %v1993_v26 = vld [vmem:[#allocation10 + $0x104] ss:$8 sps:$4 sm:$0xff]  }
 0x163   :  { %848 = vmatpush2.bf16.msra.mxu1 %v1904_v27  ;;  %v1988_v27 = vld [vmem:[#allocation10] ss:$8 sps:$4 sm:$0xff]  }
 0x164   :  { %849 = vmatprep.subr.bf16.mxu1 %v1912_v28  ;;  %v1991_v28 = vld [vmem:[#allocation10 + $0x100] ss:$8 sps:$4 sm:$0xff]  }
 0x167   :  { %850 = vmatpush2.bf16.msra.mxu1 %v1910_v29  ;;  %v1996_v29 = vld [vmem:[#allocation10 + $0xf4] ss:$8 sps:$4 sm:$0xff]  }
 0x168   :  { %851 = vmatprep.subr.bf16.mxu1 %v1918_v30  ;;  %v1999_v30 = vld [vmem:[#allocation10 + $0x1f4] ss:$8 sps:$4 sm:$0xff]  }
 0x16b   :  { %852 = vmatpush2.bf16.msra.mxu1 %v1916_v31  ;;  %v1994_v31 = vld [vmem:[#allocation10 + $0xf0] ss:$8 sps:$4 sm:$0xff]  }
 0x16c   :  { %853 = vmatprep.subr.bf16.mxu1 %v1924_v32  ;;  %v1997_v32 = vld [vmem:[#allocation10 + $0x1f0] ss:$8 sps:$4 sm:$0xff]  }
 0x16f   :  { %854 = vmatpush2.bf16.msra.mxu1 %v1922_v33  ;;  %v2002_v33 = vld [vmem:[#allocation10 + $0xe4] ss:$8 sps:$4 sm:$0xff]  }
 0x170   :  { %855 = vmatprep.subr.bf16.mxu1 %v1930_v34  ;;  %v2005_v34 = vld [vmem:[#allocation10 + $0x1e4] ss:$8 sps:$4 sm:$0xff]  }
 0x173   :  { %856 = vmatpush2.bf16.msra.mxu1 %v1928_v35  ;;  %v2000_v35 = vld [vmem:[#allocation10 + $0xe0] ss:$8 sps:$4 sm:$0xff]  }
 0x174   :  { %857 = vmatprep.subr.bf16.mxu1 %v1936_v36  ;;  %v2003_v36 = vld [vmem:[#allocation10 + $0x1e0] ss:$8 sps:$4 sm:$0xff]  }
 0x177   :  { %858 = vmatpush2.bf16.msra.mxu1 %v1934_v38  ;;  %v2011_v38 = vld [vmem:[#allocation10 + $0x1d4] ss:$8 sps:$4 sm:$0xff]  }
 0x178   :  { %859 = vmatprep.subr.bf16.mxu1 %v1942_v40  ;;  %v2009_v40 = vld [vmem:[#allocation10 + $0x1d0] ss:$8 sps:$4 sm:$0xff]  }
 0x17b   :  { %860 = vmatpush2.bf16.msra.mxu1 %v1940_v42  ;;  %v2017_v42 = vld [vmem:[#allocation10 + $0x1c4] ss:$8 sps:$4 sm:$0xff]  }
 0x17c   :  { %1315 = vmatprep.subr.bf16.mxu1 %v1948_v44  ;;  %v2015_v44 = vld [vmem:[#allocation10 + $0x1c0] ss:$8 sps:$4 sm:$0xff]  }
 0x1fe   :  { %v412_v53 = vpop.f32.mrf.mxu1 }
 0x1ff   :  { %v413_v54 = vadd.f32 %v412_v53, %v291_v51  ;;  %v2021_v51 = vld [vmem:[#allocation10 + $0x1b0] ss:$8 sps:$4 sm:$0xff]   ;;  %v2029_v53 = vld [vmem:[#allocation10 + $0x1a4] ss:$8 sps:$4 sm:$0xff]  }
 0x200   :  { %v414_v55 = vpop.f32.mrf.mxu1 }
 0x201   :  { %v415_v56 = vadd.f32 %v414_v55, %v295_v52  ;;  %v419_v57 = vmax.f32 %v413_v54, 0.0  ;;  %v2026_v52 = vld [vmem:[#allocation10 + $0xa4] ss:$8 sps:$4 sm:$0xff]   ;;  %v2024_v54 = vld [vmem:[#allocation10 + $0xa0] ss:$8 sps:$4 sm:$0xff]  }
 0x202   :  { %v416_v58 = vpop.f32.mrf.mxu1  ;;  %v2027_v55 = vld [vmem:[#allocation10 + $0x1a0] ss:$8 sps:$4 sm:$0xff]  }
 0x203   :  { %v420_v59 = vmax.f32 %v415_v56, 0.0  ;;  %v421_v0 = vpack.c.bf16 %v419_v57, %v419_v57  ;;  %v2032_v56 = vld [vmem:[#allocation10 + $0x94] ss:$8 sps:$4 sm:$0xff]   ;;  %v2030_v58 = vld [vmem:[#allocation10 + $0x90] ss:$8 sps:$4 sm:$0xff]  }
 0x204   :  { %v417_v60 = vpop.f32.mrf.mxu1  ;;  %v2035_v57 = vld [vmem:[#allocation10 + $0x194] ss:$8 sps:$4 sm:$0xff]  }
 0x205   :  { %v422_v61 = vpack.c.bf16 %v420_v59, %v420_v59  ;;  %v2033_v59 = vld [vmem:[#allocation10 + $0x190] ss:$8 sps:$4 sm:$0xff]   ;;  %v2038_v60 = vld [vmem:[#allocation10 + $0x84] ss:$8 sps:$4 sm:$0xff]  }
 0x207   :  { %861 = vmatprep.mubr.bf16.mxu1 %v422_v61  ;;  %902 = vmatprep.mubr.bf16.mxu0 %v422_v61  ;;  %v2041_v61 = vld [vmem:[#allocation10 + $0x184] ss:$8 sps:$4 sm:$0xff]  }
 0x208   :  { %862 = vmatmul.mubr.bf16.vlgmr.msra.gmra.mxu1 %v421_v0  ;;  %903 = vmatmul.mubr.bf16.vlgmr.msra.gmra.mxu0 %v421_v0  ;;  %v2042_v0 = vld [vmem:[#allocation11 + $0x78] sm:$0xff]  }
 0x209   :  { %1316 = vmatpush1.bf16.msra.mxu1 %v1946_v62  ;;  %1357 = vmatpush1.bf16.msra.mxu0 %v1949_v63  ;;  %v2036_v62 = vld [vmem:[#allocation10 + $0x80] ss:$8 sps:$4 sm:$0xff]  }
 0x20a   :  { %1317 = vmatprep.subr.bf16.mxu1 %v1954_v1  ;;  %1358 = vmatprep.subr.bf16.mxu0 %v1957_v2  ;;  %v2039_v63 = vld [vmem:[#allocation10 + $0x180] ss:$8 sps:$4 sm:$0xff]   ;;  %v499_v1 = vsub.s32 2, %v2311_v47 }
 0x20b   :  { %v487_v2 = vld [vmem:[%s2351_s6] sm:$0xf] }
 0x20d   :  { %1318 = vmatpush1.bf16.msra.mxu1 %v1952_v3  ;;  %1359 = vmatpush1.bf16.msra.mxu0 %v1955_v4  ;;  %v503_v3 = vsub.s32 3, %v2311_v47  ;;  %v492_v4 = vrot.slane %v487_v2, %v2314_v48 }
 0x20e   :  { %1319 = vmatprep.subr.bf16.mxu1 %v1960_v5  ;;  %1360 = vmatprep.subr.bf16.mxu0 %v1963_v6  ;;  %v500_v5 = vrot.slane %v487_v2, %v499_v1  ;;  %v496_v6 = vrot.slane %v487_v2, %v2320_v50 }
 0x211   :  { %1320 = vmatpush1.bf16.msra.mxu1 %v1958_v7  ;;  %1361 = vmatpush1.bf16.msra.mxu0 %v1961_v8  ;;  %v504_v7 = vrot.slane %v487_v2, %v503_v3 }
 0x212   :  { %1321 = vmatprep.subr.bf16.mxu1 %v1966_v9  ;;  %1362 = vmatprep.subr.bf16.mxu0 %v1969_v10 }
 0x215   :  { %1322 = vmatpush1.bf16.msra.mxu1 %v1964_v11  ;;  %1363 = vmatpush1.bf16.msra.mxu0 %v1967_v12 }
 0x216   :  { %1323 = vmatprep.subr.bf16.mxu1 %v1972_v13  ;;  %1364 = vmatprep.subr.bf16.mxu0 %v1975_v14 }
 0x219   :  { %1324 = vmatpush1.bf16.msra.mxu1 %v1970_v15  ;;  %1365 = vmatpush1.bf16.msra.mxu0 %v1973_v16 }
 0x21a   :  { %1325 = vmatprep.subr.bf16.mxu1 %v1978_v17  ;;  %1366 = vmatprep.subr.bf16.mxu0 %v1981_v18 }
 0x21d   :  { %1326 = vmatpush1.bf16.msra.mxu1 %v1976_v19  ;;  %1367 = vmatpush1.bf16.msra.mxu0 %v1979_v20 }
 0x21e   :  { %1327 = vmatprep.subr.bf16.mxu1 %v1984_v21  ;;  %1368 = vmatprep.subr.bf16.mxu0 %v1987_v22 }
 0x221   :  { %1328 = vmatpush1.bf16.msra.mxu1 %v1982_v23  ;;  %1369 = vmatpush1.bf16.msra.mxu0 %v1985_v24 }
 0x222   :  { %1329 = vmatprep.subr.bf16.mxu1 %v1990_v25  ;;  %1370 = vmatprep.subr.bf16.mxu0 %v1993_v26  ;;  %v2043_v25 = vld [vmem:[#allocation11 + $0x38] sm:$0xff]  }
 0x225   :  { %1330 = vmatpush1.bf16.msra.mxu1 %v1988_v27  ;;  %1371 = vmatpush1.bf16.msra.mxu0 %v1991_v28  ;;  %v2044_v28 = vld [vmem:[#allocation11 + $0x70] sm:$0xff]  }
 0x226   :  { %1331 = vmatprep.subr.bf16.mxu1 %v1996_v29  ;;  %1372 = vmatprep.subr.bf16.mxu0 %v1999_v30  ;;  %v2045_v29 = vld [vmem:[#allocation11 + $0x30] sm:$0xff]   ;;  %v2046_v30 = vld [vmem:[#allocation11 + $0x68] sm:$0xff]  }
 0x229   :  { %1332 = vmatpush2.bf16.msra.mxu1 %v1994_v31  ;;  %1373 = vmatpush2.bf16.msra.mxu0 %v1997_v32  ;;  %v2047_v31 = vld [vmem:[#allocation11 + $0x28] sm:$0xff]   ;;  %v2048_v32 = vld [vmem:[#allocation11 + $0x60] sm:$0xff]  }
 0x22a   :  { %1333 = vmatprep.subr.bf16.mxu1 %v2002_v33  ;;  %1374 = vmatprep.subr.bf16.mxu0 %v2005_v34  ;;  %v2049_v33 = vld [vmem:[#allocation11 + $0x20] sm:$0xff]   ;;  %v2050_v34 = vld [vmem:[#allocation11 + $0x58] sm:$0xff]  }
 0x22d   :  { %1334 = vmatpush2.bf16.msra.mxu1 %v2000_v35  ;;  %1375 = vmatpush2.bf16.msra.mxu0 %v2003_v36  ;;  %v2051_v35 = vld [vmem:[#allocation11 + $0x18] sm:$0xff]   ;;  %v2052_v36 = vld [vmem:[#allocation11 + $0x50] sm:$0xff]  }
 0x22e   :  { %1335 = vmatprep.subr.bf16.mxu1 %v2008_v37  ;;  %1376 = vmatprep.subr.bf16.mxu0 %v2011_v38  ;;  %v2053_v37 = vld [vmem:[#allocation11 + $0x10] sm:$0xff]   ;;  %v2054_v38 = vld [vmem:[#allocation11 + $0x48] sm:$0xff]  }
 0x231   :  { %1336 = vmatpush2.bf16.msra.mxu1 %v2006_v39  ;;  %1377 = vmatpush2.bf16.msra.mxu0 %v2009_v40  ;;  %v2055_v39 = vld [vmem:[#allocation11 + $0x8] sm:$0xff]   ;;  %v2056_v40 = vld [vmem:[#allocation11 + $0x40] sm:$0xff]  }
 0x232   :  { %1337 = vmatprep.subr.bf16.mxu1 %v2014_v41  ;;  %1378 = vmatprep.subr.bf16.mxu0 %v2017_v42  ;;  %v2057_v41 = vld [vmem:[#allocation11] sm:$0xff]  }
 0x233   :  { %v983_v42 = vld [vmem:[%s2353_s8] sm:$0x3] }
 0x235   :  { %1338 = vmatpush2.bf16.msra.mxu1 %v2012_v43  ;;  %1379 = vmatpush2.bf16.msra.mxu0 %v2015_v44  ;;  %v988_v43 = vrot.slane %v983_v42, %v2314_v48  ;;  %v992_v44 = vrot.slane %v983_v42, %v2320_v50 }
 0x236   :  { %1339 = vmatprep.subr.bf16.mxu1 %v2020_v45  ;;  %1380 = vmatprep.subr.bf16.mxu0 %v2023_v46 }
 0x239   :  { %1340 = vmatpush2.bf16.msra.mxu1 %v2018_v49  ;;  %1381 = vmatpush2.bf16.msra.mxu0 %v2021_v51 }
 0x23a   :  { %1341 = vmatprep.subr.bf16.mxu1 %v2026_v52  ;;  %1382 = vmatprep.subr.bf16.mxu0 %v2029_v53 }
 0x23d   :  { %1342 = vmatpush2.bf16.msra.mxu1 %v2024_v54  ;;  %1383 = vmatpush2.bf16.msra.mxu0 %v2027_v55 }
 0x23e   :  { %1343 = vmatprep.subr.bf16.mxu1 %v2032_v56  ;;  %1384 = vmatprep.subr.bf16.mxu0 %v2035_v57 }
 0x241   :  { %1344 = vmatpush2.bf16.msra.mxu1 %v2030_v58  ;;  %1385 = vmatpush2.bf16.msra.mxu0 %v2033_v59 }
 0x242   :  { %1345 = vmatprep.subr.bf16.mxu1 %v2038_v60  ;;  %1386 = vmatprep.subr.bf16.mxu0 %v2041_v61 }
 0x245   :  { %1346 = vmatpush2.bf16.msra.mxu1 %v2036_v62  ;;  %1387 = vmatpush2.bf16.msra.mxu0 %v2039_v63 }
 0x246   :  { %1780 = vmatprep.subr.bf16.mxu1 %v2042_v0  ;;  %v1761_v0 = vld [vmem:[%s2355_s10] ss:$0 sm:$0xff] }
 0x2c8   :  { %v863_v8 = vpop.f32.mrf.mxu1  ;;  %v904_v9 = vpop.f32.mrf.mxu0 }
 0x2c9   :  { %v864_v10 = vadd.f32 %v863_v8, %v492_v4  ;;  %v905_v11 = vadd.f32 %v904_v9, %v500_v5  ;;  %v1778_v5 = vld [vmem:[%s2356_s11] ss:$0 sm:$0xff] }
 0x2ca   :  { %v865_v12 = vpop.f32.mrf.mxu1  ;;  %v906_v13 = vpop.f32.mrf.mxu0  ;;  %v1779_v8 = vld [vmem:[#allocation2] ss:$0 sm:$0xff] }
 0x2cb   :  { %v866_v14 = vadd.f32 %v865_v12, %v496_v6  ;;  %v907_v15 = vadd.f32 %v906_v13, %v504_v7  ;;  %v911_v16 = vmax.f32 %v864_v10, 0.0  ;;  %v913_v17 = vmax.f32 %v905_v11, 0.0 }
 0x2cc   :  { %v867_v18 = vpop.f32.mrf.mxu1  ;;  %v908_v19 = vpop.f32.mrf.mxu0 }
 0x2cd   :  { %v912_v20 = vmax.f32 %v866_v14, 0.0  ;;  %v914_v47 = vmax.f32 %v907_v15, 0.0  ;;  %v915_v26 = vpack.c.bf16 %v911_v16, %v911_v16  ;;  %v917_v27 = vpack.c.bf16 %v913_v17, %v913_v17 }
 0x2ce   :  { %v868_v21 = vpop.f32.mrf.mxu1  ;;  %v909_v22 = vpop.f32.mrf.mxu0 }
 0x2cf   :  { %v916_v23 = vpack.c.bf16 %v912_v20, %v912_v20  ;;  %v918_v24 = vpack.c.bf16 %v914_v47, %v914_v47 }
 0x2d1   :  { %1347 = vmatprep.mubr.bf16.mxu1 %v916_v23  ;;  %1388 = vmatprep.mubr.bf16.mxu0 %v918_v24 }
 0x2d2   :  { %1348 = vmatmul.mubr.bf16.vlgmr.msra.gmra.mxu1 %v915_v26  ;;  %1389 = vmatmul.mubr.bf16.vlgmr.msra.gmra.mxu0 %v917_v27 }
 0x2d3   :  { %1781 = vmatpush3.bf16.msra.mxu1 %v2043_v25 }
 0x2d4   :  { %1782 = vmatprep.subr.bf16.mxu1 %v2044_v28 }
 0x2d7   :  { %1783 = vmatpush3.bf16.msra.mxu1 %v2045_v29 }
 0x2d8   :  { %1784 = vmatprep.subr.bf16.mxu1 %v2046_v30 }
 0x2db   :  { %1785 = vmatpush3.bf16.msra.mxu1 %v2047_v31 }
 0x2dc   :  { %1786 = vmatprep.subr.bf16.mxu1 %v2048_v32 }
 0x2df   :  { %1787 = vmatpush3.bf16.msra.mxu1 %v2049_v33 }
 0x2e0   :  { %1788 = vmatprep.subr.bf16.mxu1 %v2050_v34 }
 0x2e3   :  { %1789 = vmatpush3.bf16.msra.mxu1 %v2051_v35 }
 0x2e4   :  { %1790 = vmatprep.subr.bf16.mxu1 %v2052_v36 }
 0x2e7   :  { %1791 = vmatpush3.bf16.msra.mxu1 %v2053_v37 }
 0x2e8   :  { %1792 = vmatprep.subr.bf16.mxu1 %v2054_v38 }
 0x2eb   :  { %1793 = vmatpush3.bf16.msra.mxu1 %v2055_v39 }
 0x2ec   :  { %1794 = vmatprep.subr.bf16.mxu1 %v2056_v40 }
 0x2ef   :  { %1795 = vmatpush3.bf16.msra.mxu1 %v2057_v41 }
 0x392   :  { %v1349_v45 = vpop.f32.mrf.mxu1  ;;  %v1390_v46 = vpop.f32.mrf.mxu0 }
 0x393   :  { %v1350_v49 = vadd.f32 %v1349_v45, %v988_v43 }
 0x394   :  { %v1351_v51 = vpop.f32.mrf.mxu1  ;;  %v1392_v52 = vpop.f32.mrf.mxu0 }
 0x395   :  { %v1391_v53 = vadd.f32 %v1390_v46, %v1350_v49  ;;  %v1352_v54 = vadd.f32 %v1351_v51, %v992_v44 }
 0x396   :  { %v1353_v55 = vpop.f32.mrf.mxu1  ;;  %v1394_v56 = vpop.f32.mrf.mxu0 }
 0x397   :  { %v1393_v57 = vadd.f32 %v1392_v52, %v1352_v54  ;;  %v1397_v58 = vmax.f32 %v1391_v53, 0.0 }
 0x398   :  { %v1354_v59 = vpop.f32.mrf.mxu1  ;;  %v1395_v60 = vpop.f32.mrf.mxu0 }
 0x399   :  { %v1398_v61 = vmax.f32 %v1393_v57, 0.0  ;;  %v1399_v63 = vpack.c.bf16 %v1397_v58, %v1397_v58 }
 0x39b   :  { %v1400_v62 = vpack.c.bf16 %v1398_v61, %v1398_v61 }
 0x39d   :  { %1568 = vmatprep.mubr.bf16.mxu1 %v1400_v62 }
 0x39e   :  { %1569 = vmatmul.mubr.bf16.vlgmr.msra.gmra.mxu1 %v1399_v63 }
 0x45e   :  { %v1796_v48 = vpop.f32.mrf.mxu1 }
 0x460   :  { %v1797_v50 = vpop.f32.mrf.mxu1 }
 0x461   :  { %v1798_v1 = vadd.f32 %v1797_v50, %v1796_v48 }
 0x462   :  { %v1799_v2 = vpop.f32.mrf.mxu1 }
 0x463   :  { %v1571_v3 = vadd.f32 %v1798_v1, %v1761_v0 }
 0x464   :  { %v1800_v4 = vpop.f32.mrf.mxu1 }
 0x465   :  { %v1576_v6 = vmax.f32 %v1571_v3, 0.0 }
 0x467   :  { %v1584_v7 = vmul.f32 %v1778_v5, %v1576_v6 }
 0x469   :  { %1585 = vadd.xlane.f32.xlu0 %v1584_v7 }
 0x4f2   :  { %v1586_v9 = vpop.xlane.xlu0 %1585 }
 0x4f3   :  { %v1594_v10 = vadd.f32 %v1779_v8, %v1586_v9 }
 0x4f5   :  { %1596 = vst.msk [vmem:[%s2358_s13] sm:$0xff] %vm1595_vm3, %v1594_v10 }
 0x4f6   :  { %1601 = vsyncpa [#allocation4], 1 }
 0x4f7   :  { %1602 = vsyncpa [#allocation6], 1 }
 0x4f8   :  { %1603 = vsyncpa [#allocation9], 1 }
 0x4f9   :  { %1604 = vsyncpa [#allocation12], 1 }

</bundles_post_ra>
